<compile_context>
chip_gen: v7x
topology: tpu7x:2x2x1
jax: 0.10.0
libtpu: 0.0.40
codegen_flags: <defaults>
</compile_context>

<pallas_src>
import functools

import jax
import jax.numpy as jnp
from jax.experimental import pallas as pl
from jax.experimental.pallas import tpu as pltpu


# --------------------------- conv core (value-level) --------------------------

def _dw_left_conv(p, cache, filt, *, T, Tc, lorder, lstride):
    """out = p + depthwise left conv over xc = concat([cache, p], time).

    p: (Bc, T, D) f32, cache: (Bc, Tc, D) f32, filt: (lorder, D) f32 values.
    Tap k reads xc[t + k*lstride] (cross-correlation, no flip).  Returns
    (out (Bc,T,D), new_cache (Bc,Tc,D)) with new_cache = last Tc rows of xc,
    i.e. the PyTorch FsmnBlock cache update.  No VMEM scratch / stitch."""
    acc = p                                     # identity path (x_per + y_left)
    for k in range(lorder):                     # small static unrolled loop
        o = k * lstride                         # window in xc is [o, o+T)
        w = filt[k][None, None, :]
        if o >= Tc:                             # fully inside p (only o == Tc)
            src = p
        elif o + T <= Tc:                       # fully inside cache (T < Tc-o)
            src = cache[:, o:o + T, :]
        else:                                   # straddles cache tail / p head
            c_len = Tc - o
            src = jnp.concatenate([cache[:, o:, :], p[:, :T - c_len, :]], axis=1)
        acc = acc + w * src
    if Tc == 0:
        new_cache = p[:, :0, :]
    elif T >= Tc:
        new_cache = p[:, T - Tc:, :]
    else:
        new_cache = jnp.concatenate([cache[:, T:, :], p], axis=1)
    return acc, new_cache


# --------------------------- Pallas kernels ----------------------------------

def _fsmn_forward_kernel(x_ref, caches_ref,
                         in_w1_ref, in_b1_ref, in_w2_ref, in_b2_ref,
                         lin_w_ref, filt_ref, aff_w_ref, aff_b_ref,
                         out_w1_ref, out_b1_ref, out_w2_ref, out_b2_ref,
                         probs_ref, ncaches_ref,
                         *, T, Tc, n_layers, lorder, lstride):
    """Whole FSMN encoder forward for one batch chunk (single grid step)."""
    Bc, _, Din = x_ref.shape
    M = Bc * T

    # --- input stack: in_linear1 -> in_linear2 -> ReLU (MXU M = Bc*T) -------
    x2 = x_ref[...].reshape(M, Din).astype(jnp.float32)
    h = jnp.dot(x2, in_w1_ref[...], preferred_element_type=jnp.float32) + in_b1_ref[...]
    h = jnp.dot(h, in_w2_ref[...], preferred_element_type=jnp.float32) + in_b2_ref[...]
    h = jnp.maximum(h, 0.0)

    # --- FSMN layers: LinearTransform -> FsmnBlock conv -> Affine + ReLU ----
    for li in range(n_layers):            # static loop; h stays resident in VMEM
        p = jnp.dot(h, lin_w_ref[li], preferred_element_type=jnp.float32)
        Dp = p.shape[-1]
        p3 = p.reshape(Bc, T, Dp)
        conv3, ncache3 = _dw_left_conv(p3, caches_ref[li].astype(jnp.float32),
                                       filt_ref[li],
                                       T=T, Tc=Tc, lorder=lorder, lstride=lstride)
        ncaches_ref[li] = ncache3.astype(ncaches_ref.dtype)
        y = jnp.dot(conv3.reshape(M, Dp), aff_w_ref[li],
                    preferred_element_type=jnp.float32) + aff_b_ref[li]
        h = jnp.maximum(y, 0.0)

    # --- output stack: out_linear1 -> out_linear2 -> softmax ----------------
    g = jnp.dot(h, out_w1_ref[...], preferred_element_type=jnp.float32) + out_b1_ref[...]
    logits = jnp.dot(g, out_w2_ref[...], preferred_element_type=jnp.float32) + out_b2_ref[...]
    m = jnp.max(logits, axis=-1, keepdims=True)
    e = jnp.exp(logits - m)
    probs = e / jnp.sum(e, axis=-1, keepdims=True)      # exact (f32 parity)
    Dout = probs.shape[-1]
    probs_ref[...] = probs.reshape(Bc, T, Dout).astype(probs_ref.dtype)


def _fsmn_block_kernel(x_ref, cache_ref, filt_ref, o_ref, ncache_ref,
                       *, T, Tc, lorder, lstride):
    """Standalone FSMNBlock.forward (rorder == 0) for one batch chunk."""
    out, ncache = _dw_left_conv(x_ref[...].astype(jnp.float32),
                                cache_ref[...].astype(jnp.float32),
                                filt_ref[...],
                                T=T, Tc=Tc, lorder=lorder, lstride=lstride)
    o_ref[...] = out.astype(o_ref.dtype)
    ncache_ref[...] = ncache.astype(ncache_ref.dtype)


# --------------------------- pallas_call wrappers -----------------------------

def _pick_batch_chunk(B, T, target_rows=256):
    """Largest divisor Bc of B with Bc*T <= target_rows (for Bc > 1) and at
    least 2 grid steps when B >= 2 (so both v7x TensorCores get work)."""
    best = 1
    for bc in range(1, B + 1):
        if B % bc:
            continue
        if bc > 1 and bc * T > target_rows:
            continue
        if B >= 2 and B // bc < 2:
            continue
        best = bc
    return best


def fsmn_forward(params, x, in_caches, cfg):
    """Whole encoder forward in ONE pallas_call.

    x: (B, T, input_dim) f32; in_caches: list of (B, proj_dim, Tc, 1) f32
    (PyTorch layout).  Returns (probs (B, T, output_dim), out_caches in the
    same PyTorch layout)."""
    B, T, Din = x.shape
    L = cfg["fsmn_layers"]
    lorder, lstride = cfg["lorder"], cfg["lstride"]
    Tc = (lorder - 1) * lstride
    assert Tc >= 1, "lorder must be >= 2 (Tc == 0 cache edge case unsupported)"

    D1a = params["in_w1"].shape[1]
    Dl = params["in_w2"].shape[1]
    Dp = params["layers"][0]["lin_w"].shape[1]
    D2a = params["out_w1"].shape[1]
    Dout = params["out_w2"].shape[1]

    # PyTorch (B, Dp, Tc, 1) caches -> (L, B, Tc, Dp); boundary-only glue.
    caches = jnp.stack([jnp.transpose(c[..., 0], (0, 2, 1)) for c in in_caches])
    lin_w = jnp.stack([l["lin_w"] for l in params["layers"]])               # (L, Dl, Dp)
    filt = jnp.stack([l["filt"] for l in params["layers"]])                 # (L, lorder, Dp)
    aff_w = jnp.stack([l["aff_w"] for l in params["layers"]])               # (L, Dp, Dl)
    aff_b = jnp.stack([l["aff_b"].reshape(1, Dl) for l in params["layers"]])  # (L, 1, Dl)

    Bc = _pick_batch_chunk(B, T)
    nb = B // Bc

    probs, ncaches = pl.pallas_call(
        functools.partial(_fsmn_forward_kernel, T=T, Tc=Tc, n_layers=L,
                          lorder=lorder, lstride=lstride),
        out_shape=(jax.ShapeDtypeStruct((B, T, Dout), x.dtype),
                   jax.ShapeDtypeStruct((L, B, Tc, Dp), x.dtype)),
        grid=(nb,),
        in_specs=[
            pl.BlockSpec((Bc, T, Din), lambda i: (i, 0, 0)),
            pl.BlockSpec((L, Bc, Tc, Dp), lambda i: (0, i, 0, 0)),
            pl.BlockSpec((Din, D1a), lambda i: (0, 0)),
            pl.BlockSpec((1, D1a), lambda i: (0, 0)),
            pl.BlockSpec((D1a, Dl), lambda i: (0, 0)),
            pl.BlockSpec((1, Dl), lambda i: (0, 0)),
            pl.BlockSpec((L, Dl, Dp), lambda i: (0, 0, 0)),
            pl.BlockSpec((L, lorder, Dp), lambda i: (0, 0, 0)),
            pl.BlockSpec((L, Dp, Dl), lambda i: (0, 0, 0)),
            pl.BlockSpec((L, 1, Dl), lambda i: (0, 0, 0)),
            pl.BlockSpec((Dl, D2a), lambda i: (0, 0)),
            pl.BlockSpec((1, D2a), lambda i: (0, 0)),
            pl.BlockSpec((D2a, Dout), lambda i: (0, 0)),
            pl.BlockSpec((1, Dout), lambda i: (0, 0)),
        ],
        out_specs=(pl.BlockSpec((Bc, T, Dout), lambda i: (i, 0, 0)),
                   pl.BlockSpec((L, Bc, Tc, Dp), lambda i: (0, i, 0, 0))),
        compiler_params=pltpu.CompilerParams(dimension_semantics=("parallel",)),
    )(x, caches,
      params["in_w1"], params["in_b1"].reshape(1, D1a),
      params["in_w2"], params["in_b2"].reshape(1, Dl),
      lin_w, filt, aff_w, aff_b,
      params["out_w1"], params["out_b1"].reshape(1, D2a),
      params["out_w2"], params["out_b2"].reshape(1, Dout))

    out_caches = [jnp.transpose(ncaches[li], (0, 2, 1))[..., None] for li in range(L)]
    return probs, out_caches


def fsmn_block_forward(x, cache_pt, filt, *, lorder, lstride):
    """Direct Pallas equivalent of PyTorch FSMNBlock.forward (rorder == 0).

    x: (B, T, D); cache_pt: (B, D, Tc, 1) (PyTorch layout); filt: (lorder, D)
    with filt[k, d] == conv_left.weight[d, 0, k, 0].  Returns (out, new_cache)
    with the cache in the same PyTorch layout."""
    # TODO(synk): rorder > 0 (conv_right branch) and the lorder == 1 (Tc == 0)
    # PyTorch slicing quirk are not implemented; streaming FSMN exports use
    # rorder = 0 and lorder >= 2.
    B, T, D = x.shape
    Tc = (lorder - 1) * lstride
    assert Tc >= 1
    cache_td = jnp.transpose(cache_pt[..., 0], (0, 2, 1))     # boundary-only glue
    Bc = _pick_batch_chunk(B, T)
    nb = B // Bc
    out, new_cache_td = pl.pallas_call(
        functools.partial(_fsmn_block_kernel, T=T, Tc=Tc,
                          lorder=lorder, lstride=lstride),
        out_shape=(jax.ShapeDtypeStruct((B, T, D), x.dtype),
                   jax.ShapeDtypeStruct((B, Tc, D), x.dtype)),
        grid=(nb,),
        in_specs=[pl.BlockSpec((Bc, T, D), lambda i: (i, 0, 0)),
                  pl.BlockSpec((Bc, Tc, D), lambda i: (i, 0, 0)),
                  pl.BlockSpec((lorder, D), lambda i: (0, 0))],
        out_specs=(pl.BlockSpec((Bc, T, D), lambda i: (i, 0, 0)),
                   pl.BlockSpec((Bc, Tc, D), lambda i: (i, 0, 0))),
        compiler_params=pltpu.CompilerParams(dimension_semantics=("parallel",)),
    )(x, cache_td, filt)
    return out, jnp.transpose(new_cache_td, (0, 2, 1))[..., None]


# --------------------------- params / references ------------------------------

def init_params(key, cfg):
    def dense(k, din, dout, bias=True):
        kw, kb = jax.random.split(k)
        w = jax.random.normal(kw, (din, dout), jnp.float32) / jnp.sqrt(din)
        b = (jax.random.normal(kb, (dout,), jnp.float32) * 0.01) if bias else None
        return w, b

    keys = jax.random.split(key, 4 + cfg["fsmn_layers"])
    in_w1, in_b1 = dense(keys[0], cfg["input_dim"], cfg["input_affine_dim"])
    in_w2, in_b2 = dense(keys[1], cfg["input_affine_dim"], cfg["linear_dim"])
    out_w1, out_b1 = dense(keys[2], cfg["linear_dim"], cfg["output_affine_dim"])
    out_w2, out_b2 = dense(keys[3], cfg["output_affine_dim"], cfg["output_dim"])
    layers = []
    for li in range(cfg["fsmn_layers"]):
        k0, k1, k2 = jax.random.split(keys[4 + li], 3)
        lin_w, _ = dense(k0, cfg["linear_dim"], cfg["proj_dim"], bias=False)  # LinearTransform (no bias)
        filt = jax.random.normal(k1, (cfg["lorder"], cfg["proj_dim"]), jnp.float32) * 0.2
        aff_w, aff_b = dense(k2, cfg["proj_dim"], cfg["linear_dim"])          # AffineTransform
        layers.append({"lin_w": lin_w, "filt": filt, "aff_w": aff_w, "aff_b": aff_b})
    return {"in_w1": in_w1, "in_b1": in_b1, "in_w2": in_w2, "in_b2": in_b2,
            "out_w1": out_w1, "out_b1": out_b1, "out_w2": out_w2, "out_b2": out_b2,
            "layers": layers}


def reference_forward(params, x, in_caches, cfg):
    lorder, lstride = cfg["lorder"], cfg["lstride"]
    h = x @ params["in_w1"] + params["in_b1"]
    h = jnp.maximum(h @ params["in_w2"] + params["in_b2"], 0.0)
    out_caches = []
    for li in range(cfg["fsmn_layers"]):
        lp = params["layers"][li]
        p = h @ lp["lin_w"]
        cache_td = jnp.transpose(in_caches[li][..., 0], (0, 2, 1))
        Tc = cache_td.shape[1]
        T = p.shape[1]
        xc = jnp.concatenate([cache_td, p], axis=1)
        conv = p
        for k in range(lorder):
            s = k * lstride
            conv = conv + lp["filt"][k][None, None, :] * xc[:, s:s + T, :]
        out_caches.append(jnp.transpose(xc[:, xc.shape[1] - Tc:, :], (0, 2, 1))[..., None])
        h = jnp.maximum(conv @ lp["aff_w"] + lp["aff_b"], 0.0)
    h = h @ params["out_w1"] + params["out_b1"]
    logits = h @ params["out_w2"] + params["out_b2"]
    return jax.nn.softmax(logits, axis=-1), out_caches


def reference_fsmn_block(x, cache_pt, filt, lorder, lstride):
    cache_td = jnp.transpose(cache_pt[..., 0], (0, 2, 1))
    T = x.shape[1]
    Tc = cache_td.shape[1]
    xc = jnp.concatenate([cache_td, x], axis=1)
    out = x
    for k in range(lorder):
        s = k * lstride
        out = out + filt[k][None, None, :] * xc[:, s:s + T, :]
    new_cache = jnp.transpose(xc[:, xc.shape[1] - Tc:, :], (0, 2, 1))[..., None]
    return out, new_cache


# --------------------------- main ---------------------------------------------

if __name__ == "__main__":
    cfg = dict(input_dim=32, input_affine_dim=16, fsmn_layers=2, linear_dim=32,
               proj_dim=16, lorder=4, rorder=0, lstride=1, rstride=1,
               output_affine_dim=16, output_dim=8)

    B, T = 2, 8
    Tc = (cfg["lorder"] - 1) * cfg["lstride"]

    key = jax.random.PRNGKey(0)
    k_par, k_x, k_c, k_bx, k_bc = jax.random.split(key, 5)
    params = init_params(k_par, cfg)
    x = jax.random.normal(k_x, (B, T, cfg["input_dim"]), jnp.float32)
    cache_keys = jax.random.split(k_c, cfg["fsmn_layers"])
    in_caches = [jax.random.normal(cache_keys[i], (B, cfg["proj_dim"], Tc, 1), jnp.float32)
                 for i in range(cfg["fsmn_layers"])]

    # --- full FSMN forward: ONE fused pallas_call ----------------------------
    fwd = jax.jit(functools.partial(fsmn_forward, cfg=cfg))
    probs, out_caches = fwd(params, x, in_caches)
    probs = jax.block_until_ready(probs)
    out_caches = [jax.block_until_ready(c) for c in out_caches]

    ref_probs, ref_caches = reference_forward(params, x, in_caches, cfg)
    assert probs.shape == (B, T, cfg["output_dim"])
    assert all(c.shape == (B, cfg["proj_dim"], Tc, 1) for c in out_caches)
    assert jnp.allclose(probs, ref_probs, atol=1e-5, rtol=1e-5)
    for c, rc in zip(out_caches, ref_caches):
        assert jnp.allclose(c, rc, atol=1e-5)

    # --- standalone FSMNBlock (the spec module) -------------------------------
    xb = jax.random.normal(k_bx, (B, T, cfg["proj_dim"]), jnp.float32)
    cb = jax.random.normal(k_bc, (B, cfg["proj_dim"], Tc, 1), jnp.float32)
    filt = params["layers"][0]["filt"]
    yb, ncb = fsmn_block_forward(xb, cb, filt,
                                 lorder=cfg["lorder"], lstride=cfg["lstride"])
    yb = jax.block_until_ready(yb)
    ncb = jax.block_until_ready(ncb)
    ref_yb, ref_ncb = reference_fsmn_block(xb, cb, filt, cfg["lorder"], cfg["lstride"])
    assert yb.shape == (B, T, cfg["proj_dim"])
    assert ncb.shape == (B, cfg["proj_dim"], Tc, 1)
    assert jnp.allclose(yb, ref_yb, atol=1e-5)
    assert jnp.allclose(ncb, ref_ncb, atol=1e-6)

    print("KERNEL_OK")
</pallas_src>

<mosaic_0001>
module attributes {stable_mosaic.version = 11 : i64} {
  func.func @_fsmn_forward_kernel(%arg0: i32, %arg1: memref<1x8x32xf32, #tpu.memory_space<vmem>>, %arg2: memref<2x1x3x16xf32, #tpu.memory_space<vmem>>, %arg3: memref<32x16xf32, #tpu.memory_space<vmem>>, %arg4: memref<1x16xf32, #tpu.memory_space<vmem>>, %arg5: memref<16x32xf32, #tpu.memory_space<vmem>>, %arg6: memref<1x32xf32, #tpu.memory_space<vmem>>, %arg7: memref<2x32x16xf32, #tpu.memory_space<vmem>>, %arg8: memref<2x4x16xf32, #tpu.memory_space<vmem>>, %arg9: memref<2x16x32xf32, #tpu.memory_space<vmem>>, %arg10: memref<2x1x32xf32, #tpu.memory_space<vmem>>, %arg11: memref<32x16xf32, #tpu.memory_space<vmem>>, %arg12: memref<1x16xf32, #tpu.memory_space<vmem>>, %arg13: memref<16x8xf32, #tpu.memory_space<vmem>>, %arg14: memref<1x8xf32, #tpu.memory_space<vmem>>, %arg15: memref<1x8x8xf32, #tpu.memory_space<vmem>>, %arg16: memref<2x1x3x16xf32, #tpu.memory_space<vmem>>) attributes {dimension_semantics = [#tpu.dimension_semantics<parallel>], iteration_bounds = array<i64: 2>, scalar_prefetch = 0 : i64, scratch_operands = 0 : i64, tpu.core_type = #tpu.core_type<tc>, window_params = [{transform_indices = @transform_0, window_bounds = array<i64: 1, 8, 32>}, {transform_indices = @transform_1, window_bounds = array<i64: 2, 1, 3, 16>}, {pipeline_mode = #tpu.pipeline_mode<synchronous>, transform_indices = @transform_2, window_bounds = array<i64: 32, 16>}, {pipeline_mode = #tpu.pipeline_mode<synchronous>, transform_indices = @transform_3, window_bounds = array<i64: 1, 16>}, {pipeline_mode = #tpu.pipeline_mode<synchronous>, transform_indices = @transform_4, window_bounds = array<i64: 16, 32>}, {pipeline_mode = #tpu.pipeline_mode<synchronous>, transform_indices = @transform_5, window_bounds = array<i64: 1, 32>}, {pipeline_mode = #tpu.pipeline_mode<synchronous>, transform_indices = @transform_6, window_bounds = array<i64: 2, 32, 16>}, {pipeline_mode = #tpu.pipeline_mode<synchronous>, transform_indices = @transform_7, window_bounds = array<i64: 2, 4, 16>}, {pipeline_mode = #tpu.pipeline_mode<synchronous>, transform_indices = @transform_8, window_bounds = array<i64: 2, 16, 32>}, {pipeline_mode = #tpu.pipeline_mode<synchronous>, transform_indices = @transform_9, window_bounds = array<i64: 2, 1, 32>}, {pipeline_mode = #tpu.pipeline_mode<synchronous>, transform_indices = @transform_10, window_bounds = array<i64: 32, 16>}, {pipeline_mode = #tpu.pipeline_mode<synchronous>, transform_indices = @transform_11, window_bounds = array<i64: 1, 16>}, {pipeline_mode = #tpu.pipeline_mode<synchronous>, transform_indices = @transform_12, window_bounds = array<i64: 16, 8>}, {pipeline_mode = #tpu.pipeline_mode<synchronous>, transform_indices = @transform_13, window_bounds = array<i64: 1, 8>}, {transform_indices = @transform_14, window_bounds = array<i64: 1, 8, 8>}, {transform_indices = @transform_15, window_bounds = array<i64: 2, 1, 3, 16>}]} {
    %c0 = arith.constant 0 : index
    %c0_0 = arith.constant 0 : index
    %c0_1 = arith.constant 0 : index
    %0 = vector.load %arg1[%c0, %c0_0, %c0_1] : memref<1x8x32xf32, #tpu.memory_space<vmem>>, vector<1x8x32xf32>
    %1 = vector.shape_cast %0 : vector<1x8x32xf32> to vector<8x32xf32>
    %c0_2 = arith.constant 0 : index
    %c0_3 = arith.constant 0 : index
    %2 = vector.load %arg3[%c0_2, %c0_3] : memref<32x16xf32, #tpu.memory_space<vmem>>, vector<32x16xf32>
    %cst = arith.constant dense<0.000000e+00> : vector<8x16xf32>
    %3 = tpu.matmul %1, %2, %cst {dimension_numbers = #tpu.dot_dimension_numbers<[1], [0], [0], [1], [0, 0, 1, 1], [], []>} : vector<8x32xf32>, vector<32x16xf32>, vector<8x16xf32> -> vector<8x16xf32>
    %c0_4 = arith.constant 0 : index
    %c0_5 = arith.constant 0 : index
    %4 = vector.load %arg4[%c0_4, %c0_5] : memref<1x16xf32, #tpu.memory_space<vmem>>, vector<1x16xf32>
    %5 = vector.broadcast %4 : vector<1x16xf32> to vector<8x16xf32>
    %6 = arith.addf %3, %5 : vector<8x16xf32>
    %c0_6 = arith.constant 0 : index
    %c0_7 = arith.constant 0 : index
    %7 = vector.load %arg5[%c0_6, %c0_7] : memref<16x32xf32, #tpu.memory_space<vmem>>, vector<16x32xf32>
    %cst_8 = arith.constant dense<0.000000e+00> : vector<8x32xf32>
    %8 = tpu.matmul %6, %7, %cst_8 {dimension_numbers = #tpu.dot_dimension_numbers<[1], [0], [0], [1], [0, 0, 1, 1], [], []>} : vector<8x16xf32>, vector<16x32xf32>, vector<8x32xf32> -> vector<8x32xf32>
    %c0_9 = arith.constant 0 : index
    %c0_10 = arith.constant 0 : index
    %9 = vector.load %arg6[%c0_9, %c0_10] : memref<1x32xf32, #tpu.memory_space<vmem>>, vector<1x32xf32>
    %10 = vector.broadcast %9 : vector<1x32xf32> to vector<8x32xf32>
    %11 = arith.addf %8, %10 : vector<8x32xf32>
    %cst_11 = arith.constant 0.000000e+00 : f32
    %12 = vector.broadcast %cst_11 : f32 to vector<8x32xf32>
    %13 = arith.maximumf %11, %12 : vector<8x32xf32>
    %c0_12 = arith.constant 0 : index
    %c0_13 = arith.constant 0 : index
    %c0_14 = arith.constant 0 : index
    %14 = vector.load %arg7[%c0_12, %c0_13, %c0_14] : memref<2x32x16xf32, #tpu.memory_space<vmem>>, vector<1x32x16xf32>
    %15 = vector.shape_cast %14 : vector<1x32x16xf32> to vector<32x16xf32>
    %cst_15 = arith.constant dense<0.000000e+00> : vector<8x16xf32>
    %16 = tpu.matmul %13, %15, %cst_15 {dimension_numbers = #tpu.dot_dimension_numbers<[1], [0], [0], [1], [0, 0, 1, 1], [], []>} : vector<8x32xf32>, vector<32x16xf32>, vector<8x16xf32> -> vector<8x16xf32>
    %17 = vector.shape_cast %16 : vector<8x16xf32> to vector<1x8x16xf32>
    %c0_16 = arith.constant 0 : index
    %c0_17 = arith.constant 0 : index
    %c0_18 = arith.constant 0 : index
    %c0_19 = arith.constant 0 : index
    %18 = vector.load %arg2[%c0_16, %c0_17, %c0_18, %c0_19] : memref<2x1x3x16xf32, #tpu.memory_space<vmem>>, vector<1x1x3x16xf32>
    %19 = vector.shape_cast %18 : vector<1x1x3x16xf32> to vector<1x3x16xf32>
    %c0_20 = arith.constant 0 : index
    %c0_21 = arith.constant 0 : index
    %c0_22 = arith.constant 0 : index
    %20 = vector.load %arg8[%c0_20, %c0_21, %c0_22] : memref<2x4x16xf32, #tpu.memory_space<vmem>>, vector<1x4x16xf32>
    %21 = vector.shape_cast %20 : vector<1x4x16xf32> to vector<4x16xf32>
    %22 = vector.extract_strided_slice %21 {offsets = [0, 0], sizes = [1, 16], strides = [1, 1]} : vector<4x16xf32> to vector<1x16xf32>
    %23 = vector.shape_cast %22 : vector<1x16xf32> to vector<16xf32>
    %24 = vector.shape_cast %23 : vector<16xf32> to vector<1x1x16xf32>
    %25 = vector.extract_strided_slice %17 {offsets = [0, 0, 0], sizes = [1, 5, 16], strides = [1, 1, 1]} : vector<1x8x16xf32> to vector<1x5x16xf32>
    %26 = tpu.concatenate %19, %25 in 1 : vector<1x3x16xf32>, vector<1x5x16xf32> -> vector<1x8x16xf32>
    %27 = vector.broadcast %24 : vector<1x1x16xf32> to vector<1x8x16xf32>
    %28 = arith.mulf %27, %26 : vector<1x8x16xf32>
    %29 = arith.addf %17, %28 : vector<1x8x16xf32>
    %30 = vector.extract_strided_slice %21 {offsets = [1, 0], sizes = [1, 16], strides = [1, 1]} : vector<4x16xf32> to vector<1x16xf32>
    %31 = vector.shape_cast %30 : vector<1x16xf32> to vector<16xf32>
    %32 = vector.shape_cast %31 : vector<16xf32> to vector<1x1x16xf32>
    %33 = vector.extract_strided_slice %19 {offsets = [0, 1, 0], sizes = [1, 2, 16], strides = [1, 1, 1]} : vector<1x3x16xf32> to vector<1x2x16xf32>
    %34 = vector.extract_strided_slice %17 {offsets = [0, 0, 0], sizes = [1, 6, 16], strides = [1, 1, 1]} : vector<1x8x16xf32> to vector<1x6x16xf32>
    %35 = tpu.concatenate %33, %34 in 1 : vector<1x2x16xf32>, vector<1x6x16xf32> -> vector<1x8x16xf32>
    %36 = vector.broadcast %32 : vector<1x1x16xf32> to vector<1x8x16xf32>
    %37 = arith.mulf %36, %35 : vector<1x8x16xf32>
    %38 = arith.addf %29, %37 : vector<1x8x16xf32>
    %39 = vector.extract_strided_slice %21 {offsets = [2, 0], sizes = [1, 16], strides = [1, 1]} : vector<4x16xf32> to vector<1x16xf32>
    %40 = vector.shape_cast %39 : vector<1x16xf32> to vector<16xf32>
    %41 = vector.shape_cast %40 : vector<16xf32> to vector<1x1x16xf32>
    %42 = vector.extract_strided_slice %19 {offsets = [0, 2, 0], sizes = [1, 1, 16], strides = [1, 1, 1]} : vector<1x3x16xf32> to vector<1x1x16xf32>
    %43 = vector.extract_strided_slice %17 {offsets = [0, 0, 0], sizes = [1, 7, 16], strides = [1, 1, 1]} : vector<1x8x16xf32> to vector<1x7x16xf32>
    %44 = tpu.concatenate %42, %43 in 1 : vector<1x1x16xf32>, vector<1x7x16xf32> -> vector<1x8x16xf32>
    %45 = vector.broadcast %41 : vector<1x1x16xf32> to vector<1x8x16xf32>
    %46 = arith.mulf %45, %44 : vector<1x8x16xf32>
    %47 = arith.addf %38, %46 : vector<1x8x16xf32>
    %48 = vector.extract_strided_slice %21 {offsets = [3, 0], sizes = [1, 16], strides = [1, 1]} : vector<4x16xf32> to vector<1x16xf32>
    %49 = vector.shape_cast %48 : vector<1x16xf32> to vector<16xf32>
    %50 = vector.shape_cast %49 : vector<16xf32> to vector<1x1x16xf32>
    %51 = vector.broadcast %50 : vector<1x1x16xf32> to vector<1x8x16xf32>
    %52 = arith.mulf %51, %17 : vector<1x8x16xf32>
    %53 = arith.addf %47, %52 : vector<1x8x16xf32>
    %54 = vector.extract_strided_slice %17 {offsets = [0, 5, 0], sizes = [1, 3, 16], strides = [1, 1, 1]} : vector<1x8x16xf32> to vector<1x3x16xf32>
    %c0_23 = arith.constant 0 : index
    %c0_24 = arith.constant 0 : index
    %c0_25 = arith.constant 0 : index
    %c0_26 = arith.constant 0 : index
    %55 = vector.load %arg16[%c0_23, %c0_24, %c0_25, %c0_26] : memref<2x1x3x16xf32, #tpu.memory_space<vmem>>, vector<1x1x3x16xf32>
    %56 = vector.shape_cast %55 : vector<1x1x3x16xf32> to vector<1x3x16xf32>
    %57 = vector.shape_cast %54 : vector<1x3x16xf32> to vector<1x1x3x16xf32>
    tpu.vector_store %arg16[%c0_23, %c0_24, %c0_25, %c0_26], %57 {strides = array<i32>} : memref<2x1x3x16xf32, #tpu.memory_space<vmem>>, vector<1x1x3x16xf32>,
    %58 = vector.shape_cast %53 : vector<1x8x16xf32> to vector<8x16xf32>
    %c0_27 = arith.constant 0 : index
    %c0_28 = arith.constant 0 : index
    %c0_29 = arith.constant 0 : index
    %59 = vector.load %arg9[%c0_27, %c0_28, %c0_29] : memref<2x16x32xf32, #tpu.memory_space<vmem>>, vector<1x16x32xf32>
    %60 = vector.shape_cast %59 : vector<1x16x32xf32> to vector<16x32xf32>
    %cst_30 = arith.constant dense<0.000000e+00> : vector<8x32xf32>
    %61 = tpu.matmul %58, %60, %cst_30 {dimension_numbers = #tpu.dot_dimension_numbers<[1], [0], [0], [1], [0, 0, 1, 1], [], []>} : vector<8x16xf32>, vector<16x32xf32>, vector<8x32xf32> -> vector<8x32xf32>
    %c0_31 = arith.constant 0 : index
    %c0_32 = arith.constant 0 : index
    %c0_33 = arith.constant 0 : index
    %62 = vector.load %arg10[%c0_31, %c0_32, %c0_33] : memref<2x1x32xf32, #tpu.memory_space<vmem>>, vector<1x1x32xf32>
    %63 = vector.shape_cast %62 : vector<1x1x32xf32> to vector<1x32xf32>
    %64 = vector.broadcast %63 : vector<1x32xf32> to vector<8x32xf32>
    %65 = arith.addf %61, %64 : vector<8x32xf32>
    %cst_34 = arith.constant 0.000000e+00 : f32
    %66 = vector.broadcast %cst_34 : f32 to vector<8x32xf32>
    %67 = arith.maximumf %65, %66 : vector<8x32xf32>
    %c1 = arith.constant 1 : index
    %c0_35 = arith.constant 0 : index
    %c0_36 = arith.constant 0 : index
    %68 = vector.load %arg7[%c1, %c0_35, %c0_36] : memref<2x32x16xf32, #tpu.memory_space<vmem>>, vector<1x32x16xf32>
    %69 = vector.shape_cast %68 : vector<1x32x16xf32> to vector<32x16xf32>
    %cst_37 = arith.constant dense<0.000000e+00> : vector<8x16xf32>
    %70 = tpu.matmul %67, %69, %cst_37 {dimension_numbers = #tpu.dot_dimension_numbers<[1], [0], [0], [1], [0, 0, 1, 1], [], []>} : vector<8x32xf32>, vector<32x16xf32>, vector<8x16xf32> -> vector<8x16xf32>
    %71 = vector.shape_cast %70 : vector<8x16xf32> to vector<1x8x16xf32>
    %c1_38 = arith.constant 1 : index
    %c0_39 = arith.constant 0 : index
    %c0_40 = arith.constant 0 : index
    %c0_41 = arith.constant 0 : index
    %72 = vector.load %arg2[%c1_38, %c0_39, %c0_40, %c0_41] : memref<2x1x3x16xf32, #tpu.memory_space<vmem>>, vector<1x1x3x16xf32>
    %73 = vector.shape_cast %72 : vector<1x1x3x16xf32> to vector<1x3x16xf32>
    %c1_42 = arith.constant 1 : index
    %c0_43 = arith.constant 0 : index
    %c0_44 = arith.constant 0 : index
    %74 = vector.load %arg8[%c1_42, %c0_43, %c0_44] : memref<2x4x16xf32, #tpu.memory_space<vmem>>, vector<1x4x16xf32>
    %75 = vector.shape_cast %74 : vector<1x4x16xf32> to vector<4x16xf32>
    %76 = vector.extract_strided_slice %75 {offsets = [0, 0], sizes = [1, 16], strides = [1, 1]} : vector<4x16xf32> to vector<1x16xf32>
    %77 = vector.shape_cast %76 : vector<1x16xf32> to vector<16xf32>
    %78 = vector.shape_cast %77 : vector<16xf32> to vector<1x1x16xf32>
    %79 = vector.extract_strided_slice %71 {offsets = [0, 0, 0], sizes = [1, 5, 16], strides = [1, 1, 1]} : vector<1x8x16xf32> to vector<1x5x16xf32>
    %80 = tpu.concatenate %73, %79 in 1 : vector<1x3x16xf32>, vector<1x5x16xf32> -> vector<1x8x16xf32>
    %81 = vector.broadcast %78 : vector<1x1x16xf32> to vector<1x8x16xf32>
    %82 = arith.mulf %81, %80 : vector<1x8x16xf32>
    %83 = arith.addf %71, %82 : vector<1x8x16xf32>
    %84 = vector.extract_strided_slice %75 {offsets = [1, 0], sizes = [1, 16], strides = [1, 1]} : vector<4x16xf32> to vector<1x16xf32>
    %85 = vector.shape_cast %84 : vector<1x16xf32> to vector<16xf32>
    %86 = vector.shape_cast %85 : vector<16xf32> to vector<1x1x16xf32>
    %87 = vector.extract_strided_slice %73 {offsets = [0, 1, 0], sizes = [1, 2, 16], strides = [1, 1, 1]} : vector<1x3x16xf32> to vector<1x2x16xf32>
    %88 = vector.extract_strided_slice %71 {offsets = [0, 0, 0], sizes = [1, 6, 16], strides = [1, 1, 1]} : vector<1x8x16xf32> to vector<1x6x16xf32>
    %89 = tpu.concatenate %87, %88 in 1 : vector<1x2x16xf32>, vector<1x6x16xf32> -> vector<1x8x16xf32>
    %90 = vector.broadcast %86 : vector<1x1x16xf32> to vector<1x8x16xf32>
    %91 = arith.mulf %90, %89 : vector<1x8x16xf32>
    %92 = arith.addf %83, %91 : vector<1x8x16xf32>
    %93 = vector.extract_strided_slice %75 {offsets = [2, 0], sizes = [1, 16], strides = [1, 1]} : vector<4x16xf32> to vector<1x16xf32>
    %94 = vector.shape_cast %93 : vector<1x16xf32> to vector<16xf32>
    %95 = vector.shape_cast %94 : vector<16xf32> to vector<1x1x16xf32>
    %96 = vector.extract_strided_slice %73 {offsets = [0, 2, 0], sizes = [1, 1, 16], strides = [1, 1, 1]} : vector<1x3x16xf32> to vector<1x1x16xf32>
    %97 = vector.extract_strided_slice %71 {offsets = [0, 0, 0], sizes = [1, 7, 16], strides = [1, 1, 1]} : vector<1x8x16xf32> to vector<1x7x16xf32>
    %98 = tpu.concatenate %96, %97 in 1 : vector<1x1x16xf32>, vector<1x7x16xf32> -> vector<1x8x16xf32>
    %99 = vector.broadcast %95 : vector<1x1x16xf32> to vector<1x8x16xf32>
    %100 = arith.mulf %99, %98 : vector<1x8x16xf32>
    %101 = arith.addf %92, %100 : vector<1x8x16xf32>
    %102 = vector.extract_strided_slice %75 {offsets = [3, 0], sizes = [1, 16], strides = [1, 1]} : vector<4x16xf32> to vector<1x16xf32>
    %103 = vector.shape_cast %102 : vector<1x16xf32> to vector<16xf32>
    %104 = vector.shape_cast %103 : vector<16xf32> to vector<1x1x16xf32>
    %105 = vector.broadcast %104 : vector<1x1x16xf32> to vector<1x8x16xf32>
    %106 = arith.mulf %105, %71 : vector<1x8x16xf32>
    %107 = arith.addf %101, %106 : vector<1x8x16xf32>
    %108 = vector.extract_strided_slice %71 {offsets = [0, 5, 0], sizes = [1, 3, 16], strides = [1, 1, 1]} : vector<1x8x16xf32> to vector<1x3x16xf32>
    %c1_45 = arith.constant 1 : index
    %c0_46 = arith.constant 0 : index
    %c0_47 = arith.constant 0 : index
    %c0_48 = arith.constant 0 : index
    %109 = vector.load %arg16[%c1_45, %c0_46, %c0_47, %c0_48] : memref<2x1x3x16xf32, #tpu.memory_space<vmem>>, vector<1x1x3x16xf32>
    %110 = vector.shape_cast %109 : vector<1x1x3x16xf32> to vector<1x3x16xf32>
    %111 = vector.shape_cast %108 : vector<1x3x16xf32> to vector<1x1x3x16xf32>
    tpu.vector_store %arg16[%c1_45, %c0_46, %c0_47, %c0_48], %111 {strides = array<i32>} : memref<2x1x3x16xf32, #tpu.memory_space<vmem>>, vector<1x1x3x16xf32>,
    %112 = vector.shape_cast %107 : vector<1x8x16xf32> to vector<8x16xf32>
    %c1_49 = arith.constant 1 : index
    %c0_50 = arith.constant 0 : index
    %c0_51 = arith.constant 0 : index
    %113 = vector.load %arg9[%c1_49, %c0_50, %c0_51] : memref<2x16x32xf32, #tpu.memory_space<vmem>>, vector<1x16x32xf32>
    %114 = vector.shape_cast %113 : vector<1x16x32xf32> to vector<16x32xf32>
    %cst_52 = arith.constant dense<0.000000e+00> : vector<8x32xf32>
    %115 = tpu.matmul %112, %114, %cst_52 {dimension_numbers = #tpu.dot_dimension_numbers<[1], [0], [0], [1], [0, 0, 1, 1], [], []>} : vector<8x16xf32>, vector<16x32xf32>, vector<8x32xf32> -> vector<8x32xf32>
    %c1_53 = arith.constant 1 : index
    %c0_54 = arith.constant 0 : index
    %c0_55 = arith.constant 0 : index
    %116 = vector.load %arg10[%c1_53, %c0_54, %c0_55] : memref<2x1x32xf32, #tpu.memory_space<vmem>>, vector<1x1x32xf32>
    %117 = vector.shape_cast %116 : vector<1x1x32xf32> to vector<1x32xf32>
    %118 = vector.broadcast %117 : vector<1x32xf32> to vector<8x32xf32>
    %119 = arith.addf %115, %118 : vector<8x32xf32>
    %cst_56 = arith.constant 0.000000e+00 : f32
    %120 = vector.broadcast %cst_56 : f32 to vector<8x32xf32>
    %121 = arith.maximumf %119, %120 : vector<8x32xf32>
    %c0_57 = arith.constant 0 : index
    %c0_58 = arith.constant 0 : index
    %122 = vector.load %arg11[%c0_57, %c0_58] : memref<32x16xf32, #tpu.memory_space<vmem>>, vector<32x16xf32>
    %cst_59 = arith.constant dense<0.000000e+00> : vector<8x16xf32>
    %123 = tpu.matmul %121, %122, %cst_59 {dimension_numbers = #tpu.dot_dimension_numbers<[1], [0], [0], [1], [0, 0, 1, 1], [], []>} : vector<8x32xf32>, vector<32x16xf32>, vector<8x16xf32> -> vector<8x16xf32>
    %c0_60 = arith.constant 0 : index
    %c0_61 = arith.constant 0 : index
    %124 = vector.load %arg12[%c0_60, %c0_61] : memref<1x16xf32, #tpu.memory_space<vmem>>, vector<1x16xf32>
    %125 = vector.broadcast %124 : vector<1x16xf32> to vector<8x16xf32>
    %126 = arith.addf %123, %125 : vector<8x16xf32>
    %c0_62 = arith.constant 0 : index
    %c0_63 = arith.constant 0 : index
    %127 = vector.load %arg13[%c0_62, %c0_63] : memref<16x8xf32, #tpu.memory_space<vmem>>, vector<16x8xf32>
    %cst_64 = arith.constant dense<0.000000e+00> : vector<8x8xf32>
    %128 = tpu.matmul %126, %127, %cst_64 {dimension_numbers = #tpu.dot_dimension_numbers<[1], [0], [0], [1], [0, 0, 1, 1], [], []>} : vector<8x16xf32>, vector<16x8xf32>, vector<8x8xf32> -> vector<8x8xf32>
    %c0_65 = arith.constant 0 : index
    %c0_66 = arith.constant 0 : index
    %129 = vector.load %arg14[%c0_65, %c0_66] : memref<1x8xf32, #tpu.memory_space<vmem>>, vector<1x8xf32>
    %130 = vector.broadcast %129 : vector<1x8xf32> to vector<8x8xf32>
    %131 = arith.addf %128, %130 : vector<8x8xf32>
    %cst_67 = arith.constant dense<0xFF800000> : vector<8xf32>
    %132 = vector.multi_reduction <maximumf>, %131, %cst_67 [1] : vector<8x8xf32> to vector<8xf32>
    %133 = vector.shape_cast %132 : vector<8xf32> to vector<8x1xf32>
    %134 = vector.broadcast %133 : vector<8x1xf32> to vector<8x8xf32>
    %135 = arith.subf %131, %134 : vector<8x8xf32>
    %136 = math.exp %135 : vector<8x8xf32>
    %cst_68 = arith.constant dense<0.000000e+00> : vector<8xf32>
    %137 = vector.multi_reduction <add>, %136, %cst_68 [1] : vector<8x8xf32> to vector<8xf32>
    %138 = vector.shape_cast %137 : vector<8xf32> to vector<8x1xf32>
    %139 = vector.broadcast %138 : vector<8x1xf32> to vector<8x8xf32>
    %140 = arith.divf %136, %139 : vector<8x8xf32>
    %141 = vector.shape_cast %140 : vector<8x8xf32> to vector<1x8x8xf32>
    %c0_69 = arith.constant 0 : index
    %c0_70 = arith.constant 0 : index
    %c0_71 = arith.constant 0 : index
    %142 = vector.load %arg15[%c0_69, %c0_70, %c0_71] : memref<1x8x8xf32, #tpu.memory_space<vmem>>, vector<1x8x8xf32>
    tpu.vector_store %arg15[%c0_69, %c0_70, %c0_71], %141 {strides = array<i32>} : memref<1x8x8xf32, #tpu.memory_space<vmem>>, vector<1x8x8xf32>,
    return
  }
  func.func @transform_0(%arg0: i32) -> (i32, i32, i32) {
    %c0_i32 = arith.constant 0 : i32
    %c0_i32_0 = arith.constant 0 : i32
    %c0_i32_1 = arith.constant 0 : i32
    return %arg0, %c0_i32, %c0_i32_0 : i32, i32, i32
  }
  func.func @transform_1(%arg0: i32) -> (i32, i32, i32, i32) {
    %c0_i32 = arith.constant 0 : i32
    %c0_i32_0 = arith.constant 0 : i32
    %c0_i32_1 = arith.constant 0 : i32
    %c0_i32_2 = arith.constant 0 : i32
    return %c0_i32, %arg0, %c0_i32_0, %c0_i32_1 : i32, i32, i32, i32
  }
  func.func @transform_2(%arg0: i32) -> (i32, i32) {
    %c0_i32 = arith.constant 0 : i32
    %c0_i32_0 = arith.constant 0 : i32
    %c0_i32_1 = arith.constant 0 : i32
    return %c0_i32, %c0_i32_0 : i32, i32
  }
  func.func @transform_3(%arg0: i32) -> (i32, i32) {
    %c0_i32 = arith.constant 0 : i32
    %c0_i32_0 = arith.constant 0 : i32
    %c0_i32_1 = arith.constant 0 : i32
    return %c0_i32, %c0_i32_0 : i32, i32
  }
  func.func @transform_4(%arg0: i32) -> (i32, i32) {
    %c0_i32 = arith.constant 0 : i32
    %c0_i32_0 = arith.constant 0 : i32
    %c0_i32_1 = arith.constant 0 : i32
    return %c0_i32, %c0_i32_0 : i32, i32
  }
  func.func @transform_5(%arg0: i32) -> (i32, i32) {
    %c0_i32 = arith.constant 0 : i32
    %c0_i32_0 = arith.constant 0 : i32
    %c0_i32_1 = arith.constant 0 : i32
    return %c0_i32, %c0_i32_0 : i32, i32
  }
  func.func @transform_6(%arg0: i32) -> (i32, i32, i32) {
    %c0_i32 = arith.constant 0 : i32
    %c0_i32_0 = arith.constant 0 : i32
    %c0_i32_1 = arith.constant 0 : i32
    %c0_i32_2 = arith.constant 0 : i32
    return %c0_i32, %c0_i32_0, %c0_i32_1 : i32, i32, i32
  }
  func.func @transform_7(%arg0: i32) -> (i32, i32, i32) {
    %c0_i32 = arith.constant 0 : i32
    %c0_i32_0 = arith.constant 0 : i32
    %c0_i32_1 = arith.constant 0 : i32
    %c0_i32_2 = arith.constant 0 : i32
    return %c0_i32, %c0_i32_0, %c0_i32_1 : i32, i32, i32
  }
  func.func @transform_8(%arg0: i32) -> (i32, i32, i32) {
    %c0_i32 = arith.constant 0 : i32
    %c0_i32_0 = arith.constant 0 : i32
    %c0_i32_1 = arith.constant 0 : i32
    %c0_i32_2 = arith.constant 0 : i32
    return %c0_i32, %c0_i32_0, %c0_i32_1 : i32, i32, i32
  }
  func.func @transform_9(%arg0: i32) -> (i32, i32, i32) {
    %c0_i32 = arith.constant 0 : i32
    %c0_i32_0 = arith.constant 0 : i32
    %c0_i32_1 = arith.constant 0 : i32
    %c0_i32_2 = arith.constant 0 : i32
    return %c0_i32, %c0_i32_0, %c0_i32_1 : i32, i32, i32
  }
  func.func @transform_10(%arg0: i32) -> (i32, i32) {
    %c0_i32 = arith.constant 0 : i32
    %c0_i32_0 = arith.constant 0 : i32
    %c0_i32_1 = arith.constant 0 : i32
    return %c0_i32, %c0_i32_0 : i32, i32
  }
  func.func @transform_11(%arg0: i32) -> (i32, i32) {
    %c0_i32 = arith.constant 0 : i32
    %c0_i32_0 = arith.constant 0 : i32
    %c0_i32_1 = arith.constant 0 : i32
    return %c0_i32, %c0_i32_0 : i32, i32
  }
  func.func @transform_12(%arg0: i32) -> (i32, i32) {
    %c0_i32 = arith.constant 0 : i32
    %c0_i32_0 = arith.constant 0 : i32
    %c0_i32_1 = arith.constant 0 : i32
    return %c0_i32, %c0_i32_0 : i32, i32
  }
  func.func @transform_13(%arg0: i32) -> (i32, i32) {
    %c0_i32 = arith.constant 0 : i32
    %c0_i32_0 = arith.constant 0 : i32
    %c0_i32_1 = arith.constant 0 : i32
    return %c0_i32, %c0_i32_0 : i32, i32
  }
  func.func @transform_14(%arg0: i32) -> (i32, i32, i32) {
    %c0_i32 = arith.constant 0 : i32
    %c0_i32_0 = arith.constant 0 : i32
    %c0_i32_1 = arith.constant 0 : i32
    return %arg0, %c0_i32, %c0_i32_0 : i32, i32, i32
  }
  func.func @transform_15(%arg0: i32) -> (i32, i32, i32, i32) {
    %c0_i32 = arith.constant 0 : i32
    %c0_i32_0 = arith.constant 0 : i32
    %c0_i32_1 = arith.constant 0 : i32
    %c0_i32_2 = arith.constant 0 : i32
    return %c0_i32, %arg0, %c0_i32_0, %c0_i32_1 : i32, i32, i32, i32
  }
}

</mosaic_0001>

<bundles_post_ra>
// kernel: fsmn_forward.1
= control target key start
LH: loop header
LB: loop body
LE: loop exit
PB: predicated region body
PF: predicated region fallthrough
CT: control target
= control target key end

     0   :  { %s2162_s0 = inlined_call_operand.vmem [shape: f32[2,8,32], index: 0, kind: input, shape index: {}]   ;;  %s2163_s1 = inlined_call_operand.vmem [shape: f32[2,2,3,16], index: 1, kind: input, shape index: {}]   ;;  %s2164_s2 = inlined_call_operand.vmem [shape: f32[32,16], index: 2, kind: input, shape index: {}]   ;;  %s2165_s3 = inlined_call_operand.vmem [shape: f32[1,16], index: 3, kind: input, shape index: {}]   ;;  %s2166_s4 = inlined_call_operand.vmem [shape: f32[16,32], index: 4, kind: input, shape index: {}]   ;;  %s2167_s5 = inlined_call_operand.vmem [shape: f32[1,32], index: 5, kind: input, shape index: {}]   ;;  %s2168_s6 = inlined_call_operand.vmem [shape: f32[2,32,16], index: 6, kind: input, shape index: {}]   ;;  %s2169_s7 = inlined_call_operand.vmem [shape: f32[2,4,16], index: 7, kind: input, shape index: {}]   ;;  %s2170_s8 = inlined_call_operand.vmem [shape: f32[2,16,32], index: 8, kind: input, shape index: {}]   ;;  %s2171_s9 = inlined_call_operand.vmem [shape: f32[2,1,32], index: 9, kind: input, shape index: {}]   ;;  %s2172_s10 = inlined_call_operand.vmem [shape: f32[32,16], index: 10, kind: input, shape index: {}]   ;;  %s2173_s11 = inlined_call_operand.vmem [shape: f32[1,16], index: 11, kind: input, shape index: {}]   ;;  %s2174_s12 = inlined_call_operand.vmem [shape: f32[16,8], index: 12, kind: input, shape index: {}]   ;;  %s2175_s13 = inlined_call_operand.vmem [shape: f32[1,8], index: 13, kind: input, shape index: {}]   ;;  %s2176_s14 = inlined_call_operand.hbm [shape: f32[2,8,8], index: 14, kind: output, shape index: {0}]   ;;  %s2177_s15 = inlined_call_operand.vmem [shape: f32[2,2,3,16], index: 15, kind: output, shape index: {1}]  }
   0x1   :  { %2182 = sst [smem:[#allocation10_spill]] %s2162_s0 }
   0x2   :  { %2183 = sst [smem:[#allocation11_spill]] %s2163_s1 }
   0x3   :  { %2184 = sst [smem:[#allocation12_spill]] %s2164_s2 }
   0x4   :  { %21 = vsyncpa [#allocation4], 0 }
   0x5   :  { %23 = vsyncpa [#allocation4 + $0x1], 0  ;;  %s1870_s18 = smov 0   ;;  %s1872_s19 = smov 0  }
   0x6   :  { %s1874_s20 = smov 0   ;;  %s1876_s21 = smov 0  }
   0x7 LB: > { %2185 = sst [smem:[#allocation7_spill]] %s1780_s20  ;;  %s1891_s22 = sadd.s32 4294967295, %s1784_s21   ;;  %s1784_s21 = sphi %s1876_s21, %s2194_s21   ;;  %s1780_s20 = sphi %s1874_s20, %s2196_s20   ;;  %s1776_s19 = sphi %s1872_s19, %s2198_s19   ;;  %s1772_s18 = sphi %s1870_s18, %s2197_s18  }
   0x8   : > { %s1496_s23 = sadd.s32 4294967294, %s1784_s21   ;;  %s1895_s24 = sadd.s32 1, %s1784_s21  }
   0x9   : > { %2186 = sst [smem:[#allocation8_spill]] %s1895_s24  ;;  %s62_s25 = sadd.s32 1, %s1780_s20 }
   0xa   : > { %s59_s26 = ssub.s32 %s1784_s21, %s1895_s24  ;;  %p69_p0 = scmp.ne.s32.totalorder %s1780_s20, %s1776_s19 }
   0xb   : > { %p60_p1 = scmp.eq.s32.totalorder %s59_s26, 0  ;;  %p70_p2 = scmp.eq.s32.totalorder %s1784_s21, 0 }
   0xc   : > { %p351_p3 = scmp.eq.s32.totalorder %s1891_s22, 1  ;;  %p356_p4 = scmp.ne.s32.totalorder %s1776_s19, %s1772_s18 }
   0xd   : > { %s1907_s27 = scalar_select %p60_p1, %s1780_s20, %s62_s25  }
   0xe   : > { %p71_p5 = por %p70_p2, %p69_p0  ;;  %p1909_p6 = por %p351_p3, %p69_p0 }
   0xf   : > { %2187 = sst [smem:[#allocation9_spill]] %s1907_s27  ;;  %p357_p7 = scmp.eq.s32.totalorder %s1496_s23, 1 }
  0x10   : > { %p1498_p9 = scmp.ge.s32.totalorder %s1784_s21, 2 }
  0x11   : > { %p1913_p8 = por %p357_p7, %p356_p4 }
  0x12   : > { %435 = sbr.rel (%p1498_p9) target bundleno = 36 (0x24), region = 64 }
  0x19   : > { %445 = sbr.rel (!%p71_p5) target bundleno = 36 (0x24), region = 72  ;;  %s447_s30 = sand.u32 (%p71_p5), 1, %s1780_s20  }
  0x1a   : > { %s1500_s16 = sshll.u32 (%p71_p5), %s1784_s21, 2  ;;  %s1499_s17 = sshll.u32 (%p71_p5), %s447_s30, 3 }
  0x1b   : > { %s2190_s1 = sld [smem:[#allocation11_spill]] (%p71_p5)  ;;  %s449_s23 = scalar_lea.vmem (%p71_p5), [#allocation2], %s1499_s17 }
  0x21   : > { %s451_s27 = scalar_lea.vmem %s2190_s1, %s1500_s16 }
  0x22   : > { %v467_v0 = vld [vmem:[%s451_s27] sm:$0xf]  ;;  %v469_v1 = vld [vmem:[%s451_s27 + $0x8] sm:$0xf] }
  0x23   : > { %468 = vst [vmem:[%s449_s23] sm:$0xf] %v467_v0  ;;  %470 = vst [vmem:[%s449_s23 + $0x4] sm:$0xf] %v469_v1 }
  0x24 PF: > { %p1501_p10 = scmp.ge.s32.totalorder %s1784_s21, 1  ;;  %p496_p11 = scmp.lt.s32.totalorder %s1784_s21, 3 }
  0x26   : > { %p497_p12 = pnand %p1501_p10, %p496_p11 }
  0x27   : > { %s2191_s2 = sld [smem:[#allocation12_spill]] (!%p497_p12)  ;;  %v1786_v5 = vmov (!%p497_p12), 0.0|0.0   ;;  %vm1787_vm0 = vmmov (!%p497_p12), 0   ;;  %v1788_v8 = vmov (!%p497_p12), 0.0   ;;  %p558_p13 = scmp.lt.s32.totalorder (!%p497_p12), %s1891_s22, 1  ;;  %vm574_vm1 = vcmask (!%p497_p12), 261120  }
  0x28   : > { %500 = sbr.rel (%p497_p12) target bundleno = 2130 (0x852), region = 113  ;;  %1640 = vmatprep.subr.bf16.mxu0 (!%p497_p12), %v1786_v5  ;;  %1576 = vmatprep.mubr.msk.f32.mxu0 (!%p497_p12), %vm1787_vm0, %v1788_v8  ;;  %s2192_s0 = sld [smem:[#allocation10_spill]] (!%p497_p12)  ;;  %v648_v11 = vld [vmem:[%s2166_s4] sm:$0xff] (!%p497_p12)  ;;  %v649_v12 = vld [vmem:[%s2166_s4 + $0x8] sm:$0xff] (!%p497_p12)  ;;  %vm657_vm2 = vcmask (!%p497_p12), 130048   ;;  %v734_v21 = vld [vmem:[%s2168_s6 + $0x10] sm:$0xff] (!%p497_p12)  ;;  %v816_v32 = vlaneseq (!%p497_p12) }
  0x29   : > { %1646 = vmatprep.subr.bf16.mxu1 (!%p497_p12), %v1786_v5  ;;  %1583 = vmatprep.mubr.msk.f32.mxu1 (!%p497_p12), %vm1787_vm0, %v1788_v8  ;;  %v1647_v13 = vpack.c.bf16 (!%p497_p12), %v649_v12, %v648_v11  ;;  %v732_v14 = vld [vmem:[%s2168_s6] sm:$0xff] (!%p497_p12)  ;;  %v733_v15 = vld [vmem:[%s2168_s6 + $0x8] sm:$0xff] (!%p497_p12)  ;;  %v735_v22 = vld [vmem:[%s2168_s6 + $0x18] sm:$0xff] (!%p497_p12)  ;;  %s2181_s27 = sand.u32 (!%p497_p12), 1, %s1776_s19   ;;  %vm853_vm3 = vcmask (!%p497_p12), 130053   ;;  %vm814_vm4 = vcmask (!%p497_p12), 1042432  }
  0x2a   : > { %v1506_v16 = vld [vmem:[%s2165_s3] ss:$0 sm:$0xff] (!%p497_p12)  ;;  %v1650_v18 = vpack.c.bf16 (!%p497_p12), %v733_v15, %v732_v14  ;;  %v1653_v23 = vpack.c.bf16 (!%p497_p12), %v735_v22, %v734_v21  ;;  %v856_v30 = vld [vmem:[%s2170_s8 + $0x8] sm:$0xff] (!%p497_p12)  ;;  %s1998_s17 = sshll.u32 (!%p497_p12), %s2181_s27, 3  ;;  %v2000_v33 = vshrl.u32 (!%p497_p12), %v816_v32, 7  ;;  %vm827_vm5 = vcmask (!%p497_p12), 1041408  }
  0x2b   : > { %1648 = vmatpush3.bf16.msra.mxu1 (!%p497_p12), %v1647_v13  ;;  %v1508_v24 = vld [vmem:[%s2167_s5] ss:$0 sm:$0xff] (!%p497_p12)  ;;  %s505_s25 = scalar_lea.vmem (!%p497_p12), [#allocation2], %s1998_s17  ;;  %vm839_vm6 = vcmask (!%p497_p12), 1040384   ;;  %v1514_v60 = vld [vmem:[%s2168_s6 + $0x28] sm:$0xff] (!%p497_p12)  ;;  %v1515_v1 = vld [vmem:[%s2168_s6 + $0x30] sm:$0xff] (!%p497_p12) }
  0x2c   : > { %1649 = vmatprep.subr.bf16.mxu1 (!%p497_p12), %v1786_v5  ;;  %v855_v29 = vld [vmem:[%s2170_s8] sm:$0xff] (!%p497_p12)  ;;  %v818_v35 = vsub.s32 (!%p497_p12), 0, %v2000_v33  ;;  %v831_v36 = vsub.s32 (!%p497_p12), 1, %v2000_v33  ;;  %v843_v41 = vsub.s32 (!%p497_p12), 2, %v2000_v33  ;;  %v849_v48 = vsub.s32 (!%p497_p12), 3, %v2000_v33  ;;  %v1521_v11 = vld [vmem:[%s2170_s8 + $0x10] sm:$0xff] (!%p497_p12) }
  0x2d   : > { %v563_v2 = vld [vmem:[%s2191_s2] sm:$0xff] (!%p497_p12)  ;;  %v564_v3 = vld [vmem:[%s2191_s2 + $0x8] sm:$0xff] (!%p497_p12)  ;;  %v565_v4 = vld [vmem:[%s2191_s2 + $0x10] sm:$0xff] (!%p497_p12)  ;;  %v1656_v31 = vpack.c.bf16 (!%p497_p12), %v856_v30, %v855_v29  ;;  %vm1312_vm7 = vcmask (!%p497_p12), 64512   ;;  %s1532_s1 = sshll.u32 (!%p497_p12), %s1891_s22, 7  ;;  %s2193_s23 = sand.u32 (!%p497_p12), 1, %s1776_s19  }
  0x2e   : > { %v1641_v6 = vpack.c.bf16 (!%p497_p12), %v564_v3, %v563_v2  ;;  %v566_v7 = vld [vmem:[%s2191_s2 + $0x18] sm:$0xff] (!%p497_p12)  ;;  %v809_v34 = vld [vmem:[%s505_s25] sm:$0x7] (!%p497_p12)  ;;  %v1518_v14 = vld [vmem:[%s505_s25 + $0x4] sm:$0x7] (!%p497_p12)  ;;  %s551_s2 = scalar_lea.vmem (!%p497_p12), [#allocation3], %s1998_s17 }
  0x2f   : > { %v1644_v9 = vpack.c.bf16 %v566_v7, %v565_v4  ;;  %s559_s20 = scalar_select %p558_p13, %s1891_s22, 1  ;;  %v810_v37 = vld [vmem:[%s2169_s7] sm:$0xf]  ;;  %v823_v38 = vrot.slane %v809_v34, 1  ;;  %v835_v44 = vrot.slane %v809_v34, 2  ;;  %v1516_v2 = vld [vmem:[%s2168_s6 + $0x38] sm:$0xff] }
  0x30   : > { %1642 = vmatpush3.bf16.msra.mxu0 %v1641_v6  ;;  %v819_v40 = vrot.slane %v810_v37, %v818_v35  ;;  %v832_v47 = vrot.slane %v810_v37, %v831_v36  ;;  %v844_v52 = vrot.slane %v810_v37, %v843_v41  ;;  %v850_v56 = vrot.slane %v810_v37, %v849_v48  ;;  %v1513_v59 = vld [vmem:[%s2168_s6 + $0x20] sm:$0xff]  ;;  %v1522_v12 = vld [vmem:[%s2170_s8 + $0x18] sm:$0xff]  ;;  %s1343_s25 = sshll.u32 %s551_s2, 4  ;;  %s1326_s30 = scalar_lea.sflag [#allocation4], %s2193_s23  ;;  %s2110_s25 = int_to_ptr.vmem [resolvable:$true] %s1343_s25 }
  0x31   : > { %1643 = vmatprep.subr.bf16.mxu0 %v1786_v5  ;;  %s1505_s24 = sshll.u32 %s559_s20, 3  ;;  %s2012_s20 = scalar_lea.vmem [#allocation5], %s1998_s17  ;;  %v1659_v63 = vpack.c.bf16 %v1514_v60, %v1513_v59  ;;  %v1662_v3 = vpack.c.bf16 %v1516_v2, %v1515_v1  ;;  %v1511_v4 = vld [vmem:[%s2171_s9] ss:$0 sm:$0xff]  ;;  %v1665_v13 = vpack.c.bf16 %v1522_v12, %v1521_v11  ;;  %v1519_v15 = vld [vmem:[%s2169_s7 + $0x4] sm:$0xf] }
  0x32   : > { %s561_s16 = scalar_lea.vmem %s2192_s0, %s1505_s24  ;;  %v1042_v21 = vrot.slane %v1518_v14, 2  ;;  %v1056_v32 = vrot.slane %v1519_v15, %v849_v48  ;;  %v1146_v37 = vld [vmem:[%s2172_s10] sm:$0xff]  ;;  %s2108_s24 = scalar_lea.hbm %s2176_s14, %s1532_s1 }
  0x33   : > { %v562_v10 = vld [vmem:[%s561_s16] sm:$0xff]  ;;  %s1722_s27 = scalar_lea.vmem %s2110_s25, 128  ;;  %s1789_s17 = smov [#allocation3]  }
  0x34   : > { %1645 = vmatpush3.bf16.msra.mxu0 %v1644_v9  ;;  %p1723_p0 = scmp.ne.s32.totalorder %s2110_s25, %s1722_s27  ;;  %s1726_s16 = sshll.u32 %s1789_s17, 4  ;;  %s1727_s16 = int_to_ptr.vmem [resolvable:$false] %s1726_s16 }
  0x35   : > { %1655 = vmatprep.subr.bf16.mxu0 %v1786_v5  ;;  %s1728_s0 = scalar_lea.vmem %s1727_s16, 256  ;;  %p1729_p3 = scmp.lt.s32.totalorder %s2110_s25, %s1727_s16 }
  0x36   : > { %p1724_p1 = pnand %p1723_p0, %p1909_p6  ;;  %p1730_p4 = scmp.lt.s32.totalorder %s1728_s0, %s1722_s27 }
  0x37   : > { %1577 = vmatmul.mubr.msk.f32.vlgmr.msra.gmra.mrb[0].mxu0 %vm574_vm1, %v562_v10 }
  0x38   : > { %1601 = vmatprep.mubr.msk.f32.mxu0 %vm1787_vm0, %v1788_v8  ;;  %1657 = vmatpush3.bf16.msra.mxu0 %v1656_v31  ;;  %p1725_p2 = pneg %p1724_p1  ;;  %p1731_p5 = por %p1730_p4, %p1729_p3 }
  0x39   : > { %1658 = vmatprep.subr.bf16.mxu0 %v1786_v5 }
  0x3a   : > { %p1732_p7 = pnand %p1731_p5, %p1725_p2 }
 0x10a   : > { %v644_v17 = vpop.f32.mrb[0].mxu0 }
 0x10b   : > { %v645_v19 = vadd.f32 %v1506_v16, %v644_v17  ;;  %v1578_v20 = vpop.f32.mrb[1].mxu0  ;;  %v1031_v16 = vrot.slane %v1518_v14, 1 }
 0x10d   : > { %1584 = vmatmul.mubr.msk.f32.vlgmr.msra.gmra.mrb[0].mxu1 %vm657_vm2, %v645_v19 }
 0x10e   : > { %1651 = vmatpush3.bf16.msra.mxu1 %v1650_v18  ;;  %1594 = vmatprep.mubr.msk.f32.mxu1 %vm1787_vm0, %v1788_v8  ;;  %v1027_v18 = vrot.slane %v1519_v15, %v818_v35 }
 0x10f   : > { %1652 = vmatprep.subr.bf16.mxu1 %v1786_v5 }
 0x112   : > { %1654 = vmatpush3.bf16.msra.mxu1 %v1653_v23 }
 0x113   : > { %1664 = vmatprep.subr.bf16.mxu1 %v1786_v5 }
 0x1e0   : > { %v727_v25 = vpop.f32.mrb[0].mxu1 }
 0x1e1   : > { %v728_v26 = vadd.f32 %v1508_v24, %v727_v25  ;;  %v1585_v27 = vpop.f32.mrb[1].mxu1  ;;  %v1039_v24 = vrot.slane %v1519_v15, %v831_v36  ;;  %v1147_v36 = vld [vmem:[%s2172_s10 + $0x8] sm:$0xff] }
 0x1e3   : > { %v731_v28 = vmax.f32 %v728_v26, 0.0 }
 0x1e5   : > { %1595 = vmatmul.mubr.msk.f32.vlgmr.msra.gmra.mrb[2].mxu1 %vm574_vm1, %v731_v28  ;;  %v1050_v28 = vrot.slane %v1519_v15, %v843_v41  ;;  %v1148_v41 = vld [vmem:[%s2172_s10 + $0x10] sm:$0xff] }
 0x1e6   : > { %1619 = vmatprep.mubr.msk.f32.mxu1 %vm1787_vm0, %v1788_v8  ;;  %1666 = vmatpush3.bf16.msra.mxu1 %v1665_v13 }
 0x1e7   : > { %1667 = vmatprep.subr.bf16.mxu1 %v1786_v5 }
 0x2b8   : > { %v805_v39 = vpop.f32.mrb[2].mxu1 }
 0x2b9   : > { %v812_v42 = vrot.slane %v805_v39, 5  ;;  %v825_v43 = vrot.slane %v805_v39, 6  ;;  %v837_v45 = vrot.slane %v805_v39, 7  ;;  %854 = vst.msk [vmem:[%s2012_s20 - $0x5] sm:$0xe0] %vm853_vm3, %v805_v39  ;;  %v1596_v46 = vpop.f32.mrb[3].mxu1  ;;  %v851_v61 = vmul.f32 %v850_v56, %v805_v39 }
 0x2bb   : > { %v815_v49 = vsel %vm814_vm4, %v809_v34, %v812_v42  ;;  %v828_v50 = vsel %vm827_vm5, %v823_v38, %v825_v43  ;;  %v840_v53 = vsel %vm839_vm6, %v835_v44, %v837_v45  ;;  %v1149_v42 = vld [vmem:[%s2172_s10 + $0x18] sm:$0xff]  ;;  %v1230_v44 = vld [vmem:[%s2174_s12] sm:$0xff] }
 0x2bc   : > { %v820_v51 = vmul.f32 %v819_v40, %v815_v49  ;;  %v833_v55 = vmul.f32 %v832_v47, %v828_v50  ;;  %v845_v58 = vmul.f32 %v844_v52, %v840_v53  ;;  %v1668_v40 = vpack.c.bf16 %v1147_v36, %v1146_v37  ;;  %v1526_v50 = vld [vmem:[%s2173_s11] ss:$0 sm:$0xff] }
 0x2bd   : > { %v1671_v43 = vpack.c.bf16 %v1149_v42, %v1148_v41 }
 0x2be   : > { %v821_v54 = vadd.f32 %v820_v51, %v805_v39 }
 0x2c0   : > { %v834_v57 = vadd.f32 %v833_v55, %v821_v54  ;;  %v1528_v54 = vld [vmem:[%s2175_s13] ss:$0 sm:$0xff] }
 0x2c2   : > { %v846_v62 = vadd.f32 %v845_v58, %v834_v57 }
 0x2c4   : > { %v852_v0 = vadd.f32 %v851_v61, %v846_v62 }
 0x2c6   : > { %1602 = vmatmul.mubr.msk.f32.vlgmr.msra.gmra.mrb[2].mxu0 %vm657_vm2, %v852_v0 }
 0x2c7   : > { %1660 = vmatpush3.bf16.msra.mxu0 %v1659_v63  ;;  %1612 = vmatprep.mubr.msk.f32.mxu0 %vm1787_vm0, %v1788_v8 }
 0x2c8   : > { %1661 = vmatprep.subr.bf16.mxu0 %v1786_v5 }
 0x2cb   : > { %1663 = vmatpush3.bf16.msra.mxu0 %v1662_v3 }
 0x2cc   : > { %1673 = vmatprep.subr.bf16.mxu0 %v1786_v5 }
 0x399   : > { %v933_v6 = vpop.f32.mrb[2].mxu0 }
 0x39a   : > { %v934_v7 = vadd.f32 %v1511_v4, %v933_v6  ;;  %v1603_v9 = vpop.f32.mrb[3].mxu0 }
 0x39c   : > { %v937_v10 = vmax.f32 %v934_v7, 0.0 }
 0x39e   : > { %1613 = vmatmul.mubr.msk.f32.vlgmr.msra.gmra.mrb[4].mxu0 %vm574_vm1, %v937_v10 }
 0x39f   : > { %1637 = vmatprep.mubr.msk.f32.mxu0 %vm1787_vm0, %v1788_v8 }
 0x471   : > { %v1012_v17 = vpop.f32.mrb[4].mxu0 }
 0x472   : > { %v1021_v19 = vrot.slane %v1012_v17, 5  ;;  %v1033_v20 = vrot.slane %v1012_v17, 6  ;;  %v1044_v22 = vrot.slane %v1012_v17, 7  ;;  %1520 = vst.msk [vmem:[%s2012_s20 - $0x1] sm:$0xe0] %vm853_vm3, %v1012_v17  ;;  %v1614_v23 = vpop.f32.mrb[5].mxu0  ;;  %v1057_v38 = vmul.f32 %v1056_v32, %v1012_v17 }
 0x474   : > { %v1023_v25 = vsel %vm814_vm4, %v1518_v14, %v1021_v19  ;;  %v1035_v26 = vsel %vm827_vm5, %v1031_v16, %v1033_v20  ;;  %v1046_v29 = vsel %vm839_vm6, %v1042_v21, %v1044_v22 }
 0x475   : > { %v1028_v27 = vmul.f32 %v1027_v18, %v1023_v25  ;;  %v1040_v31 = vmul.f32 %v1039_v24, %v1035_v26  ;;  %v1051_v35 = vmul.f32 %v1050_v28, %v1046_v29 }
 0x477   : > { %v1029_v30 = vadd.f32 %v1028_v27, %v1012_v17 }
 0x479   : > { %v1041_v34 = vadd.f32 %v1040_v31, %v1029_v30 }
 0x47b   : > { %v1052_v39 = vadd.f32 %v1051_v35, %v1041_v34 }
 0x47d   : > { %v1058_v33 = vadd.f32 %v1057_v38, %v1052_v39 }
 0x47f   : > { %1620 = vmatmul.mubr.msk.f32.vlgmr.msra.gmra.mrb[4].mxu1 %vm657_vm2, %v1058_v33 }
 0x480   : > { %1669 = vmatpush3.bf16.msra.mxu1 %v1668_v40  ;;  %1630 = vmatprep.mubr.msk.f32.mxu1 %vm1787_vm0, %v1788_v8  ;;  %v1231_v8 = vld [vmem:[%s2174_s12 + $0x8] sm:$0xff] }
 0x481   : > { %1670 = vmatprep.subr.bf16.mxu1 %v1786_v5  ;;  %v1674_v45 = vpack.c.bf16 %v1231_v8, %v1230_v44  ;;  %v1524_v5 = vld [vmem:[%s2171_s9 + $0x1] ss:$0 sm:$0xff] }
 0x483   : > { %1675 = vmatpush3.bf16.msra.mxu0 %v1674_v45 }
 0x484   : > { %1672 = vmatpush3.bf16.msra.mxu1 %v1671_v43 }
 0x552   : > { %v1141_v46 = vpop.f32.mrb[4].mxu1 }
 0x553   : > { %v1142_v47 = vadd.f32 %v1524_v5, %v1141_v46  ;;  %v1621_v48 = vpop.f32.mrb[5].mxu1 }
 0x555   : > { %v1145_v49 = vmax.f32 %v1142_v47, 0.0 }
 0x557   : > { %1631 = vmatmul.mubr.msk.f32.vlgmr.msra.gmra.mrb[6].mxu1 %vm574_vm1, %v1145_v49 }
 0x62a   : > { %v1226_v51 = vpop.f32.mrb[6].mxu1 }
 0x62b   : > { %v1227_v52 = vadd.f32 %v1526_v50, %v1226_v51  ;;  %v1632_v53 = vpop.f32.mrb[7].mxu1 }
 0x62d   : > { %1638 = vmatmul.mubr.msk.f32.vlgmr.msra.gmra.mrb[6].mxu0 %vm657_vm2, %v1227_v52 }
 0x700   : > { %v1308_v55 = vpop.f32.mrb[6].mxu0 }
 0x701   : > { %v1309_v56 = vadd.f32 %v1528_v54, %v1308_v55  ;;  %v1639_v57 = vpop.f32.mrb[7].mxu0 }
 0x703   : > { %v1313_v58 = vsel %vm1312_vm7, %v1309_v56, -inf }
 0x704   : > { %1314 = vmax.xlane.f32.xlu0 %v1313_v58 }
 0x791   : > { %v1315_v59 = vpop.xlane.xlu0 %1314 }
 0x792   : > { %v1316_v60 = vsub.f32 %v1309_v56, %v1315_v59 }
 0x794   : > { %v1317_v61 = vmul.f32 1.442695, %v1316_v60 }
 0x796   : > { %1718 = vpow2.f32 %v1317_v61 }
 0x7a0   : > { %v1719_v62 = vpop.eup %1718 }
 0x7a1   : > { %v1319_v63 = vsel %vm1312_vm7, %v1719_v62, 0.0 }
 0x7a2   : > { %1320 = vadd.xlane.f32.xlu0 %v1319_v63 }
 0x82f   : > { %v1321_v0 = vpop.xlane.xlu0 %1320 }
 0x830   : > { %1720 = vrcp.f32 %v1321_v0 }
 0x83a   : > { %v1721_v1 = vpop.eup %1720 }
 0x83b   : > { %v1323_v2 = vmul.f32 %v1721_v1, %v1719_v62 }
 0x83d   : > { %1324 = vst.msk [vmem:[%s551_s2] sm:$0xff] %vm1312_vm7, %v1323_v2 }
 0x83e   : > { %1735 = shalt.err (!%p1732_p7)
}
 0x83f   : > { %s1736_s1 = scalar_lea.hbm %s2108_s24, 128  ;;  %s1740_s23 = scalar_lea.hbm %s2176_s14, 256 }
 0x840   : > { %p1737_p10 = scmp.ne.s32.totalorder %s2108_s24, %s1736_s1  ;;  %p1741_p13 = scmp.lt.u32.totalorder %s2108_s24, %s2176_s14 }
 0x841   : > { %p1742_p0 = scmp.lt.u32.totalorder %s1740_s23, %s1736_s1  ;;  %p1744_p2 = scmp.lt.u32.totalorder %s1736_s1, %s2108_s24 }
 0x842   : > { %p1738_p11 = pnand %p1737_p10, %p1909_p6 }
 0x843   : > { %p1743_p1 = por %p1742_p0, %p1741_p13 }
 0x844   : > { %p1739_p12 = pneg %p1738_p11 }
 0x845   : > { %p1745_p3 = por %p1744_p2, %p1743_p1 }
 0x847   : > { %p1746_p4 = pnand %p1745_p3, %p1739_p12 }
 0x849   : > { %1749 = shalt.err (!%p1746_p4)
}
 0x84a   : > { %1676 = dma.vmem_to_hbm [thread:$0]  (%p1909_p6), %s2110_s25, 128, %s2108_s24, %s1326_s30   ;;  %v1367_v3 = vld [vmem:[%s2012_s20] sm:$0xf] (%p1909_p6)  ;;  %v1369_v4 = vld [vmem:[%s2012_s20 + $0x4] sm:$0xf] (%p1909_p6) }
 0x84b   : > { %1349 = sbr.rel (!%p1909_p6) target bundleno = 2130 (0x852), region = 125  ;;  %s1533_s27 = sshll.u32 (%p1909_p6), %s1891_s22, 2 }
 0x84c   : > { %s1351_s1 = scalar_lea.vmem (%p1909_p6), %s2177_s15, %s1533_s27 }
 0x84d   : > { %1368 = vst [vmem:[%s1351_s1] sm:$0xf] (%p1909_p6), %v1367_v3  ;;  %1370 = vst [vmem:[%s1351_s1 + $0x8] sm:$0xf] (%p1909_p6), %v1369_v4 }
 0x852 PF: > { %s1403_s25 = sand.u32 1, %s1772_s18   ;;  %p1679_p6 = pnand %p1498_p9, %p1913_p8 }
 0x853   : > { %s1404_s28 = scalar_lea.sflag [#allocation4], %s1403_s25 }
 0x854   : > { %1767 = dma.done.wait (!%p1679_p6), %s1404_s28, 128  }
 0x855   : > { %1769 = vsyncadd (!%p1679_p6), %s1404_s28, 4294967168  ;;  %s2194_s21 = sld [smem:[#allocation8_spill]]  ;;  %s2195_s22 = sld [smem:[#allocation7_spill]] }
 0x856   : > { %s2196_s20 = sld [smem:[#allocation9_spill]]  ;;  %s2197_s18 = smov %s1776_s19 }
 0x85b   : > { %p26_p5 = scmp.ge.s32.totalorder %s2194_s21, 4   ;;  %s2198_s19 = smov %s2195_s22 }
 0x85d   :  { %28 = sbr.rel (!%p26_p5) target bundleno = 7 (0x7), region = 219 }
 0x864   :  { %1416 = vsyncpa [#allocation4], 1 }
 0x865   :  { %1418 = vsyncpa [#allocation4 + $0x1], 1 }

</bundles_post_ra>
